<compile_context>
chip_gen: v7x
topology: tpu7x:2x2x1
jax: 0.10.0
libtpu: 0.0.40
codegen_flags: <defaults>
</compile_context>

<pallas_src>
import jax
import jax.numpy as jnp
from jax import lax
from jax.experimental import pallas as pl
from jax.experimental.pallas import tpu as pltpu

LANES = 128


def _make_kernel(K, C, OC, H, W, Ho, Wo, PH, PW, NB):
    WC = W * C
    M = NB * Ho

    def kernel(x_ref, wt_ref, bias_ref, o_ref):
        # x_ref:    (NB, H, W*C)    bf16  channels-last, (w, c) fused onto lanes
        # wt_ref:   (K*W*C, 128)    bf16  Toeplitz conv weights * BN scale, 0-padded
        # bias_ref: (1, 128)        f32   folded BN bias (tiled per ow, 0-padded)
        # o_ref:    (NB, PH, 128)   f32   pooled output, lane-dense (128-padded)
        x = x_ref[...]

        # Conv as K accumulating MXU dots: for each kh, the Ho sublane-shifted
        # row window of x (M x 64, bf16) hits the kh-th 64-row slab of the
        # Toeplitz weight.  The kw/c unrolling lives inside the weight, so no
        # lane-concat im2col is needed; accumulate in f32.
        def dot_kh(kh):
            lhs = x[:, kh:kh + Ho, :].reshape(M, WC)                # (M, 64)
            slab = wt_ref[pl.ds(kh * WC, WC), :]                    # (64, 128)
            return jnp.dot(lhs, slab, preferred_element_type=jnp.float32)

        acc = dot_kh(0)
        for kh in range(1, K):
            acc = acc + dot_kh(kh)                                  # (M, 128) f32

        # Folded BN bias + ReLU (the scale is already folded into the weights).
        y = jnp.maximum(acc + bias_ref[...], 0.0)                   # (M, 128)

        # Separable 2x2 / stride-1 max pool on the full 128-lane block:
        #   W direction = lane rotate by OC, H direction = sublane shift by 1.
        # For the PW*OC lanes we keep, the rotate never wraps into padding.
        y_sh = jnp.concatenate([y[:, OC:], y[:, :OC]], axis=-1)     # rot-left OC
        zw = jnp.maximum(y, y_sh)                                   # (M, 128)
        zw = zw.reshape(NB, Ho, LANES)
        p = jnp.maximum(zw[:, :PH, :], zw[:, 1:PH + 1, :])          # (NB, PH, 128)

        o_ref[...] = p.astype(o_ref.dtype)

    return kernel


def _expanded_weights(w_oihw, W, scale, lanes=LANES):
    """Expand OIHW conv weights (times per-OC BN scale, folded in f32) into a
    (K*W*C, lanes) Toeplitz matrix such that
      lhs[(oh), kh*W*C + w*C + c] @ wt[:, ow*OC + oc]
    realises the valid conv.  Columns >= Wo*OC are zero padding."""
    OC, C, K, _ = w_oihw.shape
    Wo = W - K + 1
    w_hwio = jnp.transpose(w_oihw, (2, 3, 1, 0)).astype(jnp.float32)   # (K,K,C,OC)
    w_hwio = w_hwio * scale[None, None, None, :].astype(jnp.float32)   # fold BN scale

    w_idx = jnp.arange(W)[:, None]            # (W, 1)
    ow_idx = jnp.arange(Wo)[None, :]          # (1, Wo)
    kw_rel = w_idx - ow_idx                   # kw = w - ow
    valid = (kw_rel >= 0) & (kw_rel < K)
    kw_cl = jnp.clip(kw_rel, 0, K - 1)

    wt = w_hwio[:, kw_cl]                                          # (K, W, Wo, C, OC)
    wt = jnp.where(valid[None, :, :, None, None], wt, 0.0)
    wt = jnp.transpose(wt, (0, 1, 3, 2, 4))                        # (K, W, C, Wo, OC)
    wt = wt.reshape(K * W * C, Wo * OC)
    return jnp.pad(wt, ((0, 0), (0, lanes - Wo * OC)))             # (K*W*C, lanes)


def conv_norm_relu_pool(x_nchw, w_oihw, gamma, beta, running_mean, running_var,
                        eps=1e-5, batch_block=None):
    """x_nchw: (N, C, H, W) f32.  Returns (N, OC, PH, PW) f32 (PyTorch NCHW)."""
    N, C, H, W = x_nchw.shape
    OC, _, K, _ = w_oihw.shape
    Ho, Wo = H - K + 1, W - K + 1
    PH, PW = Ho - 1, Wo - 1
    assert Ho >= 2 and Wo >= 2, "2x2/stride-1 pool needs conv output >= 2x2"
    assert Wo * OC <= LANES, "single-lane-tile output design requires Wo*OC <= 128"

    # Grid: fold the whole batch into the matmul M dim by default (grid steps
    # are serial on v5e/v6e).  Only split 2-way (v7x megacore) when each step
    # still has a substantial M.
    if batch_block is None:
        if N % 2 == 0 and (N // 2) * Ho >= 128:
            batch_block = N // 2
        else:
            batch_block = N
    if N % batch_block != 0:
        batch_block = N
    NB = batch_block
    G = N // NB

    # Fold eval-mode BatchNorm: scale goes into the weights (in f32, before the
    # bf16 cast); bias stays as a 128-lane f32 row tiled to the ow*OC layout.
    scale = gamma / jnp.sqrt(running_var + eps)
    bias = beta - running_mean * scale
    bias_t = jnp.pad(jnp.tile(bias, Wo), (0, LANES - Wo * OC))
    bias_t = bias_t.reshape(1, LANES).astype(jnp.float32)

    # NCHW -> (N, H, W*C): channels-last with (w, c) fused onto lanes (64 lanes
    # instead of 4); bf16 for the MXU + half the HBM->VMEM DMA bytes.
    # TODO(synk): accept/emit NHWC (or the lane-dense kernel layout) directly
    # when the surrounding graph allows, to drop these two XLA transposes.
    x3d = jnp.transpose(x_nchw, (0, 2, 3, 1)).reshape(N, H, W * C)
    x3d = x3d.astype(jnp.bfloat16)
    wt = _expanded_weights(w_oihw, W, scale).astype(jnp.bfloat16)    # (K*W*C, 128)

    kernel = _make_kernel(K, C, OC, H, W, Ho, Wo, PH, PW, NB)

    flops = 2 * N * Ho * (K * W * C) * LANES
    bytes_accessed = (x3d.size * 2 + wt.size * 2 + bias_t.size * 4
                      + N * PH * LANES * 4)

    out = pl.pallas_call(
        kernel,
        out_shape=jax.ShapeDtypeStruct((N, PH, LANES), jnp.float32),
        grid_spec=pltpu.PrefetchScalarGridSpec(
            num_scalar_prefetch=0,
            grid=(G,),
            in_specs=[
                pl.BlockSpec((NB, H, W * C), lambda g: (g, 0, 0)),
                pl.BlockSpec((K * W * C, LANES), lambda g: (0, 0)),
                pl.BlockSpec((1, LANES), lambda g: (0, 0)),
            ],
            out_specs=pl.BlockSpec((NB, PH, LANES), lambda g: (g, 0, 0)),
        ),
        compiler_params=pltpu.CompilerParams(
            dimension_semantics=("parallel",)),
        cost_estimate=pl.CostEstimate(flops=flops, transcendentals=0,
                                      bytes_accessed=bytes_accessed),
    )(x3d, wt, bias_t)

    # Lane-dense (N, PH, 128) -> slice the real PW*OC lanes -> PyTorch NCHW.
    out = out[..., :PW * OC].reshape(N, PH, PW, OC)
    return jnp.transpose(out, (0, 3, 1, 2))


def _reference(x_nchw, w_oihw, gamma, beta, running_mean, running_var, eps=1e-5):
    """Pure-JAX f32 reference of the same forward pass (for validation)."""
    y = lax.conv_general_dilated(
        x_nchw, w_oihw, window_strides=(1, 1), padding="VALID",
        dimension_numbers=("NCHW", "OIHW", "NCHW"))
    scale = gamma / jnp.sqrt(running_var + eps)
    bias = beta - running_mean * scale
    y = y * scale[None, :, None, None] + bias[None, :, None, None]
    y = jnp.maximum(y, 0.0)
    y = lax.reduce_window(y, -jnp.inf, lax.max,
                          window_dimensions=(1, 1, 2, 2),
                          window_strides=(1, 1, 1, 1), padding="VALID")
    return y


if __name__ == "__main__":
    key = jax.random.PRNGKey(0)
    k_x, k_w, k_g, k_b = jax.random.split(key, 4)

    N, C, H, W = 2, 4, 16, 16
    OC, K = 8, 3

    x = jax.random.normal(k_x, (N, C, H, W), dtype=jnp.float32)
    w = jax.random.normal(k_w, (OC, C, K, K), dtype=jnp.float32) * 0.1
    gamma = 1.0 + 0.1 * jax.random.normal(k_g, (OC,), dtype=jnp.float32)
    beta = 0.1 * jax.random.normal(k_b, (OC,), dtype=jnp.float32)
    running_mean = jnp.zeros((OC,), dtype=jnp.float32)   # fresh BN stats (eval mode)
    running_var = jnp.ones((OC,), dtype=jnp.float32)

    out = conv_norm_relu_pool(x, w, gamma, beta, running_mean, running_var)
    out = jax.block_until_ready(out)

    ref = _reference(x, w, gamma, beta, running_mean, running_var)
    assert out.shape == (N, OC, H - K + 1 - 1, W - K + 1 - 1)
    # Tolerance re-verified for the bf16-MXU path with BN scale folded into the
    # weights in f32 before the bf16 cast (scale ~1): only bf16 rounding of x
    # and w*scale deviates from the f32 reference, well inside 2e-2.
    assert jnp.allclose(out, ref, atol=2e-2, rtol=2e-2), "mismatch vs JAX reference"

    print("KERNEL_OK")
</pallas_src>

<mosaic_0001>
module attributes {stable_mosaic.version = 11 : i64} {
  func.func @kernel(%arg0: i32, %arg1: memref<2x16x64xbf16, #tpu.memory_space<vmem>>, %arg2: memref<192x128xbf16, #tpu.memory_space<vmem>>, %arg3: memref<1x128xf32, #tpu.memory_space<vmem>>, %arg4: memref<2x13x128xf32, #tpu.memory_space<vmem>>) attributes {dimension_semantics = [#tpu.dimension_semantics<parallel>], iteration_bounds = array<i64: 1>, scalar_prefetch = 0 : i64, scratch_operands = 0 : i64, tpu.core_type = #tpu.core_type<tc>, window_params = [{transform_indices = @transform_0, window_bounds = array<i64: 2, 16, 64>}, {pipeline_mode = #tpu.pipeline_mode<synchronous>, transform_indices = @transform_1, window_bounds = array<i64: 192, 128>}, {pipeline_mode = #tpu.pipeline_mode<synchronous>, transform_indices = @transform_2, window_bounds = array<i64: 1, 128>}, {transform_indices = @transform_3, window_bounds = array<i64: 2, 13, 128>}]} {
    %c0 = arith.constant 0 : index
    %c0_0 = arith.constant 0 : index
    %c0_1 = arith.constant 0 : index
    %0 = vector.load %arg1[%c0, %c0_0, %c0_1] : memref<2x16x64xbf16, #tpu.memory_space<vmem>>, vector<2x16x64xbf16>
    %1 = vector.extract_strided_slice %0 {offsets = [0, 0, 0], sizes = [2, 14, 64], strides = [1, 1, 1]} : vector<2x16x64xbf16> to vector<2x14x64xbf16>
    %2 = vector.shape_cast %1 : vector<2x14x64xbf16> to vector<28x64xbf16>
    %c0_2 = arith.constant 0 : index
    %c0_3 = arith.constant 0 : index
    %3 = vector.load %arg2[%c0_2, %c0_3] : memref<192x128xbf16, #tpu.memory_space<vmem>>, vector<64x128xbf16>
    %cst = arith.constant dense<0.000000e+00> : vector<28x128xf32>
    %4 = tpu.matmul %2, %3, %cst {dimension_numbers = #tpu.dot_dimension_numbers<[1], [0], [0], [1], [0, 0, 1, 1], [], []>} : vector<28x64xbf16>, vector<64x128xbf16>, vector<28x128xf32> -> vector<28x128xf32>
    %5 = vector.extract_strided_slice %0 {offsets = [0, 1, 0], sizes = [2, 14, 64], strides = [1, 1, 1]} : vector<2x16x64xbf16> to vector<2x14x64xbf16>
    %6 = vector.shape_cast %5 : vector<2x14x64xbf16> to vector<28x64xbf16>
    %c64 = arith.constant 64 : index
    %c0_4 = arith.constant 0 : index
    %7 = vector.load %arg2[%c64, %c0_4] : memref<192x128xbf16, #tpu.memory_space<vmem>>, vector<64x128xbf16>
    %cst_5 = arith.constant dense<0.000000e+00> : vector<28x128xf32>
    %8 = tpu.matmul %6, %7, %cst_5 {dimension_numbers = #tpu.dot_dimension_numbers<[1], [0], [0], [1], [0, 0, 1, 1], [], []>} : vector<28x64xbf16>, vector<64x128xbf16>, vector<28x128xf32> -> vector<28x128xf32>
    %9 = arith.addf %4, %8 : vector<28x128xf32>
    %10 = vector.extract_strided_slice %0 {offsets = [0, 2, 0], sizes = [2, 14, 64], strides = [1, 1, 1]} : vector<2x16x64xbf16> to vector<2x14x64xbf16>
    %11 = vector.shape_cast %10 : vector<2x14x64xbf16> to vector<28x64xbf16>
    %c128 = arith.constant 128 : index
    %c0_6 = arith.constant 0 : index
    %12 = vector.load %arg2[%c128, %c0_6] : memref<192x128xbf16, #tpu.memory_space<vmem>>, vector<64x128xbf16>
    %cst_7 = arith.constant dense<0.000000e+00> : vector<28x128xf32>
    %13 = tpu.matmul %11, %12, %cst_7 {dimension_numbers = #tpu.dot_dimension_numbers<[1], [0], [0], [1], [0, 0, 1, 1], [], []>} : vector<28x64xbf16>, vector<64x128xbf16>, vector<28x128xf32> -> vector<28x128xf32>
    %14 = arith.addf %9, %13 : vector<28x128xf32>
    %c0_8 = arith.constant 0 : index
    %c0_9 = arith.constant 0 : index
    %15 = vector.load %arg3[%c0_8, %c0_9] : memref<1x128xf32, #tpu.memory_space<vmem>>, vector<1x128xf32>
    %16 = vector.broadcast %15 : vector<1x128xf32> to vector<28x128xf32>
    %17 = arith.addf %14, %16 : vector<28x128xf32>
    %cst_10 = arith.constant 0.000000e+00 : f32
    %18 = vector.broadcast %cst_10 : f32 to vector<28x128xf32>
    %19 = arith.maximumf %17, %18 : vector<28x128xf32>
    %20 = vector.extract_strided_slice %19 {offsets = [0, 8], sizes = [28, 120], strides = [1, 1]} : vector<28x128xf32> to vector<28x120xf32>
    %21 = vector.extract_strided_slice %19 {offsets = [0, 0], sizes = [28, 8], strides = [1, 1]} : vector<28x128xf32> to vector<28x8xf32>
    %22 = tpu.concatenate %20, %21 in 1 : vector<28x120xf32>, vector<28x8xf32> -> vector<28x128xf32>
    %23 = arith.maximumf %19, %22 : vector<28x128xf32>
    %24 = vector.shape_cast %23 : vector<28x128xf32> to vector<2x14x128xf32>
    %25 = vector.extract_strided_slice %24 {offsets = [0, 0, 0], sizes = [2, 13, 128], strides = [1, 1, 1]} : vector<2x14x128xf32> to vector<2x13x128xf32>
    %26 = vector.extract_strided_slice %24 {offsets = [0, 1, 0], sizes = [2, 13, 128], strides = [1, 1, 1]} : vector<2x14x128xf32> to vector<2x13x128xf32>
    %27 = arith.maximumf %25, %26 : vector<2x13x128xf32>
    %c0_11 = arith.constant 0 : index
    %c0_12 = arith.constant 0 : index
    %c0_13 = arith.constant 0 : index
    %28 = vector.load %arg4[%c0_11, %c0_12, %c0_13] : memref<2x13x128xf32, #tpu.memory_space<vmem>>, vector<2x13x128xf32>
    tpu.vector_store %arg4[%c0_11, %c0_12, %c0_13], %27 {strides = array<i32>} : memref<2x13x128xf32, #tpu.memory_space<vmem>>, vector<2x13x128xf32>,
    return
  }
  func.func @transform_0(%arg0: i32) -> (i32, i32, i32) {
    %c0_i32 = arith.constant 0 : i32
    %c0_i32_0 = arith.constant 0 : i32
    %c0_i32_1 = arith.constant 0 : i32
    return %arg0, %c0_i32, %c0_i32_0 : i32, i32, i32
  }
  func.func @transform_1(%arg0: i32) -> (i32, i32) {
    %c0_i32 = arith.constant 0 : i32
    %c0_i32_0 = arith.constant 0 : i32
    %c0_i32_1 = arith.constant 0 : i32
    return %c0_i32, %c0_i32_0 : i32, i32
  }
  func.func @transform_2(%arg0: i32) -> (i32, i32) {
    %c0_i32 = arith.constant 0 : i32
    %c0_i32_0 = arith.constant 0 : i32
    %c0_i32_1 = arith.constant 0 : i32
    return %c0_i32, %c0_i32_0 : i32, i32
  }
  func.func @transform_3(%arg0: i32) -> (i32, i32, i32) {
    %c0_i32 = arith.constant 0 : i32
    %c0_i32_0 = arith.constant 0 : i32
    %c0_i32_1 = arith.constant 0 : i32
    return %arg0, %c0_i32, %c0_i32_0 : i32, i32, i32
  }
}

</mosaic_0001>

<bundles_post_ra>
// kernel: tpu_custom_call.1
= control target key start
LH: loop header
LB: loop body
LE: loop exit
PB: predicated region body
PF: predicated region fallthrough
CT: control target
= control target key end

     0   :  { %8 = vsyncpa [#allocation3], 0  ;;  %s1580_s0 = inlined_call_operand.hbm [shape: bf16[2,16,64], index: 0, kind: input, shape index: {}]   ;;  %s1581_s1 = inlined_call_operand.hbm [shape: bf16[192,128], index: 1, kind: input, shape index: {}]   ;;  %s1582_s2 = inlined_call_operand.vmem [shape: f32[1,128], index: 2, kind: input, shape index: {}]   ;;  %s1583_s3 = inlined_call_operand.vmem [shape: f32[2,13,128], index: 3, kind: output, shape index: {}]  }
   0x1   :  { %9 = vsyncpa [#allocation5], 0  ;;  %s1261_s12 = smov [#allocation2]   ;;  %s1213_s16 = scalar_lea.hbm %s1580_s0, 256 }
   0x2   :  { %s15_s13 = sshll.u32 %s1261_s12, 4  ;;  %p1214_p0 = scmp.ne.s32.totalorder %s1580_s0, %s1213_s16  ;;  %s16_s13 = int_to_ptr.vmem [resolvable:$true] %s15_s13 }
   0x3   :  { %p1217_p1 = scmp.lt.u32.totalorder %s1213_s16, %s1580_s0 }
   0x5   :  { %p1219_p2 = pnand %p1217_p1, %p1214_p0 }
   0x7   :  { %1222 = shalt.err (!%p1219_p2)
}
   0x8   :  { %s1223_s21 = scalar_lea.vmem %s16_s13, 256  ;;  %p1228_p4 = scmp.lt.s32.totalorder %s16_s13, %s16_s13 }
   0x9   :  { %p1224_p3 = scmp.ne.s32.totalorder %s16_s13, %s1223_s21  ;;  %p1229_p5 = scmp.lt.s32.totalorder %s1223_s21, %s1223_s21 }
   0xb   :  { %p1230_p6 = por %p1229_p5, %p1228_p4 }
   0xd   :  { %p1231_p7 = pnand %p1230_p6, %p1224_p3 }
   0xf   :  { %1234 = shalt.err (!%p1231_p7)
}
  0x10   :  { %s1262_s22 = smov 64   ;;  %s1263_s23 = smov 4  }
  0x11   :  { %21 = dma.hbm_to_vmem [thread:$0]  %s1580_s0, 256, %s16_s13, [#allocation3], %s1262_s22, %s1262_s22, %s1263_s23  }
  0x12   :  { %s1264_s26 = smov [#allocation4]   ;;  %s1235_s30 = scalar_lea.hbm %s1581_s1, 1536 }
  0x13   :  { %s27_s27 = sshll.u32 %s1264_s26, 4  ;;  %p1236_p8 = scmp.ne.s32.totalorder %s1581_s1, %s1235_s30  ;;  %s28_s27 = int_to_ptr.vmem [resolvable:$true] %s27_s27 }
  0x14   :  { %p1239_p9 = scmp.lt.u32.totalorder %s1235_s30, %s1581_s1 }
  0x16   :  { %p1241_p10 = pnand %p1239_p9, %p1236_p8 }
  0x18   :  { %1244 = shalt.err (!%p1241_p10)
}
  0x19   :  { %s1245_s8 = scalar_lea.vmem %s28_s27, 1536  ;;  %p1250_p12 = scmp.lt.s32.totalorder %s28_s27, %s28_s27 }
  0x1a   :  { %p1246_p11 = scmp.ne.s32.totalorder %s28_s27, %s1245_s8  ;;  %p1251_p13 = scmp.lt.s32.totalorder %s1245_s8, %s1245_s8 }
  0x1c   :  { %p1252_p0 = por %p1251_p13, %p1250_p12 }
  0x1e   :  { %p1253_p1 = pnand %p1252_p0, %p1246_p11 }
  0x20   :  { %1256 = shalt.err (!%p1253_p1)
}
  0x21   :  { %33 = dma.hbm_to_vmem [thread:$0]  %s1581_s1, 1536, %s28_s27, [#allocation5], %s1262_s22, %s1262_s22, %s1263_s23  }
  0x22   :  { %1257 = dma.done.wait [#allocation3], 256  }
  0x23   :  { %1258 = vsyncadd [#allocation3], 4294967040 }
  0x24   :  { %1259 = dma.done.wait [#allocation5], 1536  }
  0x25   :  { %1260 = vsyncadd [#allocation5], 4294965760  ;;  %vm155_vm0 = vsmask.f32 256  ;;  %vm156_vm1 = vsmask.f32 1284  ;;  %v62_v2 = vlaneseq }
  0x26   :  { %vm158_vm2 = vsmask.f32 2312  ;;  %v1265_v0 = vmov 1966171168   ;;  %vm157_vm3 = vmor %vm155_vm0, %vm156_vm1  ;;  %vm160_vm5 = vsmask.f32 3340 }
  0x27   :  { %v60_v1 = vunpack.c.l.s4 %v1265_v0  ;;  %vm159_vm4 = vmor %vm157_vm3, %vm158_vm2  ;;  %v1312_v4 = vshrl.u32 %v62_v2, 7  ;;  %vm162_vm7 = vsmask.f32 4368  ;;  %vm164_vm8 = vsmask.f32 5396  ;;  %v1201_v5 = vld [vmem:[#allocation4] sm:$0xff]  }
  0x28   :  { %vm161_vm6 = vmor %vm159_vm4, %vm160_vm5  ;;  %v1202_v6 = vld [vmem:[#allocation4 + $0x8] sm:$0xff]   ;;  %1162 = vmatprep.subr.bf16.mxu0 %v1201_v5  ;;  %vm166_vm10 = vsmask.f32 6424  ;;  %v1203_v7 = vld [vmem:[#allocation4 + $0x10] sm:$0xff]   ;;  %vm168_vm11 = vsmask.f32 7452 }
  0x29   :  { %v61_v3 = vunpack.c.0.s8 %v60_v1  ;;  %vm163_vm9 = vmor %vm161_vm6, %vm162_vm7  ;;  %1163 = vmatpush3.bf16.msra.mxu0 %v1201_v5  ;;  %v1205_v9 = vld [vmem:[#allocation4 + $0x20] sm:$0xff]   ;;  %v1090_v10 = vld.sshfl [vmem:[#allocation2] sm:$0x33 pattern:$0x75316420]  ;;  %vm405_vm13 = vcmask 523264  }
  0x2a   :  { %1164 = vmatprep.subr.bf16.mxu0 %v1202_v6  ;;  %1150 = vmatprep.subr.bf16.mxu1 %v1205_v9  ;;  %v1091_v11 = vld.sshfl [vmem:[#allocation2 + $0x4] sm:$0x33 pattern:$0x75316420]  ;;  %v58_v12 = vcombine.high %v1090_v10, %v1090_v10  ;;  %vm1321_vm12 = vmor %vm163_vm9, %vm164_vm8  ;;  %v1204_v15 = vld [vmem:[#allocation4 + $0x18] sm:$0xff]   ;;  %s1266_s11 = smov 120  }
  0x2b   :  { %v1315_v8 = vsub.s32 %v61_v3, %v1312_v4  ;;  %1151 = vmatpush3.bf16.msra.mxu1 %v1205_v9  ;;  %v1092_v16 = vld.sshfl [vmem:[#allocation2 + $0x8] sm:$0x33 pattern:$0x75316420]  ;;  %v82_v17 = vcombine.high %v1091_v11, %v1091_v11  ;;  %v1207_v19 = vld [vmem:[#allocation4 + $0x28] sm:$0xff]   ;;  %vm1359_vm14 = vmor %vm1321_vm12, %vm166_vm10  ;;  %vm921_vm0 = vcmask 1040384  }
  0x2c   :  { %v105_v21 = vcombine.high %v1092_v16, %v1092_v16  ;;  %1152 = vmatprep.subr.bf16.mxu1 %v1207_v19  ;;  %v1093_v25 = vld.sshfl [vmem:[#allocation2 + $0xc] sm:$0x33 pattern:$0x75316420]  ;;  %v1209_v36 = vld [vmem:[#allocation4 + $0x30] sm:$0xff]   ;;  %v1206_v39 = vld [vmem:[#allocation4 + $0x40] sm:$0xff]  }
  0x2d   :  { %v1318_v13 = vrot.slane %v1090_v10, %v1315_v8  ;;  %1165 = vmatpush3.bf16.msra.mxu0 %v1202_v6  ;;  %v1326_v18 = vrot.slane %v1091_v11, %v1315_v8  ;;  %v1329_v20 = vrot.slane %v58_v12, %v1315_v8  ;;  %v1332_v22 = vrot.slane %v1092_v16, %v1315_v8  ;;  %v1211_v49 = vld [vmem:[#allocation4 + $0x38] sm:$0xff]   ;;  %vm1403_vm15 = vmor %vm1359_vm14, %vm168_vm11 }
  0x2e   :  { %1166 = vmatprep.subr.bf16.mxu0 %v1203_v7  ;;  %v1335_v23 = vrot.slane %v82_v17, %v1315_v8  ;;  %v1346_v27 = vrot.slane %v105_v21, %v1315_v8  ;;  %v129_v34 = vcombine.high %v1093_v25, %v1093_v25  ;;  %v1368_v35 = vrot.slane %v1093_v25, %v1315_v8  ;;  %v1208_v21 = vld [vmem:[#allocation4 + $0x48] sm:$0xff]  }
  0x2f   :  { %v1339_v24 = vcombine.high %v1326_v18, %v1326_v18  ;;  %v1343_v26 = vcombine.high %v1318_v13, %v1318_v13  ;;  %v461_v28 = vcombine.low %v1318_v13, %v1329_v20  ;;  %v1114_v29 = vcombine.high %v1318_v13, %v1329_v20  ;;  %1153 = vmatpush3.bf16.msra.mxu1 %v1207_v19 }
  0x30   :  { %v1354_v30 = vcombine.high %v1332_v22, %v1332_v22  ;;  %v463_v32 = vcombine.low %v1326_v18, %v1335_v23  ;;  %v1374_v40 = vcombine.high %v1346_v27, %v1346_v27  ;;  %v1381_v44 = vrot.slane %v129_v34, %v1315_v8  ;;  %1154 = vmatprep.subr.bf16.mxu1 %v1209_v36 }
  0x31   :  { %1167 = vmatpush3.bf16.msra.mxu0 %v1203_v7  ;;  %v464_v33 = vcombine.low %v1339_v24, %v1332_v22  ;;  %v471_v37 = vrot.slane %v461_v28, %v1315_v8  ;;  %v478_v38 = vrot.slane %v1114_v29, %v1315_v8  ;;  %v1385_v45 = vcombine.high %v1368_v35, %v1368_v35 }
  0x32   :  { %1168 = vmatprep.subr.bf16.mxu0 %v1204_v15  ;;  %v510_v41 = vcombine.low %v1346_v27, %v1354_v30  ;;  %v485_v42 = vrot.slane %v463_v32, %v1315_v8  ;;  %v511_v47 = vcombine.low %v1374_v40, %v1368_v35  ;;  %v1392_v50 = vcombine.high %v1329_v20, %v1329_v20 }
  0x33   :  { %v492_v43 = vrot.slane %v464_v33, %v1315_v8  ;;  %v493_v46 = vcombine.low %v471_v37, %v478_v38  ;;  %v512_v52 = vcombine.low %v1381_v44, %v1385_v45  ;;  %v1398_v53 = vcombine.high %v1335_v23, %v1335_v23  ;;  %1155 = vmatpush3.bf16.msra.mxu1 %v1209_v36 }
  0x34   :  { %v519_v48 = vrot.slane %v510_v41, %v1315_v8  ;;  %v171_v55 = vshrl.u32 %v1318_v13, 16  ;;  %v526_v57 = vrot.slane %v511_v47, %v1315_v8  ;;  %v176_v58 = vshll.u32 %v1329_v20, 16  ;;  %1156 = vmatprep.subr.bf16.mxu1 %v1211_v49 }
  0x35   :  { %1169 = vmatpush3.bf16.msra.mxu0 %v1204_v15  ;;  %v494_v51 = vcombine.low %v485_v42, %v492_v43  ;;  %v501_v56 = vrot.slane %v493_v46, %v1315_v8  ;;  %v179_v59 = vshrl.u32 %v1329_v20, 16  ;;  %v533_v61 = vrot.slane %v512_v52, %v1315_v8 }
  0x36   :  { %1174 = vmatprep.subr.bf16.mxu0 %v1206_v39  ;;  %v184_v62 = vshll.u32 %v1343_v26, 16  ;;  %v187_v63 = vshrl.u32 %v1343_v26, 16  ;;  %v534_v0 = vcombine.low %v519_v48, %v526_v57  ;;  %v178_v1 = vsel %vm1403_vm15, %v171_v55, %v176_v58  ;;  %v1210_v48 = vld [vmem:[#allocation4 + $0x50] sm:$0xff]  }
  0x37   :  { %v508_v60 = vrot.slane %v494_v51, %v1315_v8  ;;  %v192_v2 = vshll.u32 %v1392_v50, 16  ;;  %v195_v3 = vshrl.u32 %v1392_v50, 16  ;;  %v548_v6 = vrot.slane %v533_v61, %v1315_v8  ;;  %1157 = vmatpush3.bf16.msra.mxu1 %v1211_v49 }
  0x38   :  { %v186_v7 = vsel %vm1403_vm15, %v179_v59, %v184_v62  ;;  %v200_v9 = vshll.u32 %v1326_v18, 16  ;;  %v541_v10 = vrot.slane %v534_v0, %v1315_v8  ;;  %v203_v12 = vshrl.u32 %v1326_v18, 16 }
  0x39   :  { %v509_v5 = vcombine.low %v501_v56, %v508_v60  ;;  %v194_v11 = vsel %vm1403_vm15, %v187_v63, %v192_v2  ;;  %v208_v13 = vshll.u32 %v1335_v23, 16  ;;  %v211_v15 = vshrl.u32 %v1335_v23, 16  ;;  %v1212_v2 = vld [vmem:[#allocation4 + $0x58] sm:$0xff]  }
  0x3a   :  { %v202_v14 = vsel %vm1403_vm15, %v195_v3, %v200_v9  ;;  %v216_v16 = vshll.u32 %v1339_v24, 16  ;;  %v219_v17 = vshrl.u32 %v1339_v24, 16  ;;  %v549_v19 = vcombine.low %v541_v10, %v548_v6 }
  0x3b   :  { %1170 = vmatprep.mubr.msk.bf16.mxu0 %vm405_vm13, %v509_v5  ;;  %v210_v25 = vsel %vm1403_vm15, %v203_v12, %v208_v13  ;;  %v224_v28 = vshll.u32 %v1398_v53, 16  ;;  %v228_v29 = vshrl.u32 %v1332_v22, 16  ;;  %v233_v32 = vshll.u32 %v1346_v27, 16 }
  0x3c   :  { %v218_v31 = vsel %vm1403_vm15, %v211_v15, %v216_v16  ;;  %v292_v33 = vcombine.low %v178_v1, %v186_v7  ;;  %v293_v34 = vcombine.low %v194_v11, %v202_v14  ;;  %1171 = vmatmul.mubr.msk.bf16.vlgmr.msra.gmra.mrb[0].mxu0 %vm405_vm13, %v549_v19  ;;  %v154_v38 = vcombine.high %v1381_v44, %v1381_v44 }
  0x3d   :  { %v226_v36 = vsel %vm1403_vm15, %v219_v17, %v224_v28  ;;  %v294_v37 = vcombine.low %v210_v25, %v218_v31  ;;  %v236_v41 = vshrl.u32 %v1346_v27, 16  ;;  %1175 = vmatpush3.bf16.msra.mxu0 %v1206_v39  ;;  %v235_v42 = vsel %vm1403_vm15, %v228_v29, %v233_v32 }
  0x3e   :  { %v302_v43 = vrot.slane %v292_v33, %v1315_v8  ;;  %v309_v46 = vrot.slane %v293_v34, %v1315_v8  ;;  %v241_v47 = vshll.u32 %v1354_v30, 16  ;;  %1176 = vmatprep.subr.bf16.mxu0 %v1208_v21  ;;  %v295_v49 = vcombine.low %v226_v36, %v235_v42 }
  0x3f   :  { %v316_v51 = vrot.slane %v294_v37, %v1315_v8  ;;  %v244_v52 = vshrl.u32 %v1354_v30, 16  ;;  %v249_v55 = vshll.u32 %v1374_v40, 16  ;;  %v252_v57 = vshrl.u32 %v1374_v40, 16 }
  0x40   :  { %v324_v56 = vcombine.low %v302_v43, %v309_v46  ;;  %v243_v39 = vsel %vm1403_vm15, %v236_v41, %v241_v47  ;;  %v257_v58 = vshll.u32 %v1368_v35, 16  ;;  %v323_v59 = vrot.slane %v295_v49, %v1315_v8 }
  0x41   :  { %v251_v60 = vsel %vm1403_vm15, %v244_v52, %v249_v55  ;;  %v260_v61 = vshrl.u32 %v1368_v35, 16  ;;  %v265_v62 = vshll.u32 %v1381_v44, 16  ;;  %1177 = vmatpush3.bf16.msra.mxu0 %v1208_v21  ;;  %v268_v0 = vshrl.u32 %v1381_v44, 16  ;;  %v1129_v52 = vld [vmem:[%s1582_s2] ss:$0 sm:$0xff] }
  0x42   :  { %v332_v30 = vrot.slane %v324_v56, %v1315_v8  ;;  %v259_v63 = vsel %vm1403_vm15, %v252_v57, %v257_v58  ;;  %v273_v40 = vshll.u32 %v1385_v45, 16  ;;  %1178 = vmatprep.subr.bf16.mxu0 %v1210_v48  ;;  %v325_v1 = vcombine.low %v316_v51, %v323_v59 }
  0x43   :  { %v267_v3 = vsel %vm1403_vm15, %v260_v61, %v265_v62  ;;  %v276_v5 = vshrl.u32 %v1385_v45, 16  ;;  %v281_v6 = vshll.u32 %v154_v38, 16  ;;  %v341_v9 = vcombine.low %v243_v39, %v251_v60 }
  0x44   :  { %v275_v7 = vsel %vm1403_vm15, %v268_v0, %v273_v40  ;;  %v342_v10 = vcombine.low %v259_v63, %v267_v3  ;;  %v637_v11 = vcombine.low %v1329_v20, %v1343_v26  ;;  %v339_v12 = vrot.slane %v325_v1, %v1315_v8 }
  0x45   :  { %v283_v13 = vsel %vm1403_vm15, %v276_v5, %v281_v6  ;;  %v638_v14 = vcombine.low %v1392_v50, %v1326_v18  ;;  %v639_v45 = vcombine.low %v1335_v23, %v1339_v24  ;;  %1179 = vmatpush3.bf16.msra.mxu0 %v1210_v48  ;;  %v350_v16 = vrot.slane %v341_v9, %v1315_v8 }
  0x46   :  { %v343_v15 = vcombine.low %v275_v7, %v283_v13  ;;  %v357_v17 = vrot.slane %v342_v10, %v1315_v8  ;;  %v640_v20 = vcombine.low %v1398_v53, %v1346_v27  ;;  %v340_v26 = vcombine.low %v332_v30, %v339_v12  ;;  %1180 = vmatprep.subr.bf16.mxu0 %v1212_v2 }
  0x47   :  { %v647_v54 = vrot.slane %v637_v11, %v1315_v8  ;;  %v654_v19 = vrot.slane %v638_v14, %v1315_v8  ;;  %v661_v18 = vrot.slane %v639_v45, %v1315_v8  ;;  %v1121_v21 = vcombine.high %v1332_v22, %v1346_v27 }
  0x48   :  { %v364_v50 = vrot.slane %v343_v15, %v1315_v8  ;;  %v365_v23 = vcombine.low %v350_v16, %v357_v17  ;;  %v668_v24 = vrot.slane %v640_v20, %v1315_v8  ;;  %1158 = vmatprep.mubr.msk.bf16.mxu1 %vm405_vm13, %v340_v26  ;;  %v687_v53 = vcombine.low %v1368_v35, %v1381_v44 }
  0x49   :  { %v669_v25 = vcombine.low %v647_v54, %v654_v19  ;;  %v1122_v28 = vcombine.high %v1368_v35, %v1381_v44  ;;  %1181 = vmatpush3.bf16.msra.mxu0 %v1212_v2  ;;  %v695_v33 = vrot.slane %v1121_v21, %v1315_v8  ;;  %v1267_v1 = vmov 1983009808  }
  0x4a   :  { %v372_v29 = vrot.slane %v365_v23, %v1315_v8  ;;  %v379_v31 = vrot.slane %v364_v50, %v1315_v8  ;;  %v670_v32 = vcombine.low %v661_v18, %v668_v24  ;;  %v702_v22 = vrot.slane %v687_v53, %v1315_v8 }
  0x4b   :  { %v677_v34 = vrot.slane %v669_v25, %v1315_v8  ;;  %v709_v27 = vrot.slane %v1122_v28, %v1315_v8  ;;  %v850_v2 = vunpack.c.l.s4 %v1267_v1  ;;  %vm922_vm1 = vcmask 1042434  }
  0x4c   :  { %v380_v36 = vcombine.low %v372_v29, %v379_v31  ;;  %v684_v37 = vrot.slane %v670_v32, %v1315_v8  ;;  %v710_v38 = vcombine.low %v695_v33, %v702_v22  ;;  %vm923_vm2 = vmor %vm921_vm0, %vm922_vm1  ;;  %vm924_vm3 = vcmask 1044484  }
  0x4d   :  { %v724_v35 = vrot.slane %v709_v27, %v1315_v8  ;;  %v851_v3 = vunpack.c.0.s8 %v850_v2  ;;  %vm925_vm4 = vmor %vm923_vm2, %vm924_vm3  ;;  %vm926_vm5 = vcmask 1046534  }
  0x4e   :  { %1159 = vmatmul.mubr.msk.bf16.vlgmr.msra.gmra.mrb[0].mxu1 %vm405_vm13, %v380_v36  ;;  %v685_v44 = vcombine.low %v677_v34, %v684_v37  ;;  %v717_v41 = vrot.slane %v710_v38, %v1315_v8  ;;  %vm1525_vm6 = vmor %vm925_vm4, %vm926_vm5 }
  0x4f   :  { %v1521_v5 = vsub.s32 %v851_v3, %v1312_v4 }
  0x50   :  { %1182 = vmatprep.mubr.msk.bf16.mxu0 %vm405_vm13, %v685_v44  ;;  %v725_v42 = vcombine.low %v717_v41, %v724_v35 }
  0x52   :  { %1183 = vmatmul.mubr.msk.bf16.vlgmr.msra.gmra.mrb[0].mxu0 %vm405_vm13, %v725_v42 }
 0x121   :  { %v1160_v43 = vpop.f32.mrb[0].mxu1 }
 0x122   :  { %v446_v46 = vpop.f32.mrb[1].mxu1 }
 0x123   :  { %v1161_v47 = vpop.f32.mrb[2].mxu1 }
 0x124   :  { %v449_v48 = vpop.f32.mrb[3].mxu1 }
 0x125   :  { %v1184_v49 = vpop.f32.mrb[0].mxu0 }
 0x126   :  { %v1186_v51 = vadd.f32 %v1184_v49, %v1160_v43  ;;  %v790_v55 = vpop.f32.mrb[1].mxu0 }
 0x127   :  { %v1187_v56 = vadd.f32 %v790_v55, %v446_v46  ;;  %v1185_v39 = vpop.f32.mrb[2].mxu0 }
 0x128   :  { %v1188_v57 = vadd.f32 %v1185_v39, %v1161_v47  ;;  %v793_v8 = vpop.f32.mrb[3].mxu0  ;;  %v818_v60 = vadd.f32 %v1186_v51, %v1129_v52 }
 0x129   :  { %v1189_v58 = vadd.f32 %v793_v8, %v449_v48  ;;  %v816_v59 = vadd.f32 %v1187_v56, %v1129_v52 }
 0x12a   :  { %v1515_v30 = vadd.f32 %v1188_v57, %v1129_v52  ;;  %v822_v0 = vmax.f32 %v818_v60, 0.0 }
 0x12b   :  { %v820_v61 = vmax.f32 %v816_v59, 0.0  ;;  %v817_v62 = vadd.f32 %v1189_v58, %v1129_v52 }
 0x12c   :  { %v823_v40 = vmax.f32 %v1515_v30, 0.0 }
 0x12d   :  { %828 = vrot.lane.b32.xlu0 %v820_v61, %s1266_s11  ;;  %v821_v63 = vmax.f32 %v817_v62, 0.0 }
 0x12f   :  { %830 = vrot.lane.b32.xlu1 %v821_v63, %s1266_s11 }
 0x131   :  { %832 = vrot.lane.b32.xlu0 %v822_v0, %s1266_s11 }
 0x133   :  { %834 = vrot.lane.b32.xlu1 %v823_v40, %s1266_s11 }
 0x19f   :  { %v829_v6 = vpop.permute.xlu0 %828 }
 0x1a0   :  { %v840_v7 = vmax.f32 %v820_v61, %v829_v6 }
 0x1a1   :  { %v831_v9 = vpop.permute.xlu1 %830 }
 0x1a2   :  { %v848_v10 = vcombine.high %v840_v7, %v840_v7  ;;  %v855_v11 = vrot.slane %v840_v7, %v1521_v5  ;;  %v841_v12 = vmax.f32 %v821_v63, %v831_v9 }
 0x1a3   :  { %v833_v13 = vpop.permute.xlu0 %832 }
 0x1a4   :  { %v862_v14 = vrot.slane %v848_v10, %v1521_v5  ;;  %v863_v45 = vcombine.high %v855_v11, %v855_v11  ;;  %v865_v15 = vcombine.high %v841_v12, %v841_v12  ;;  %v1130_v4 = vrot.slane %v855_v11, 9 }
 0x1a5   :  { %v872_v17 = vrot.slane %v841_v12, %v1521_v5  ;;  %v842_v20 = vmax.f32 %v822_v0, %v833_v13  ;;  %v835_v60 = vpop.permute.xlu1 %834 }
 0x1a6   :  { %v864_v26 = vcombine.high %v862_v14, %v862_v14  ;;  %v930_v54 = vrot.slane %v863_v45, 7  ;;  %v933_v19 = vrot.slane %v862_v14, 7  ;;  %v879_v18 = vrot.slane %v865_v15, %v1521_v5 }
 0x1a7   :  { %v880_v50 = vcombine.high %v872_v17, %v872_v17  ;;  %v939_v23 = vrot.slane %v872_v17, 7  ;;  %v882_v24 = vcombine.high %v842_v20, %v842_v20  ;;  %v889_v21 = vrot.slane %v842_v20, %v1521_v5 }
 0x1a8   :  { %v931_v25 = vsel %vm1525_vm6, %v1130_v4, %v930_v54  ;;  %v932_v53 = vrot.slane %v930_v54, 2  ;;  %v935_v28 = vrot.slane %v933_v19, 2  ;;  %v936_v29 = vrot.slane %v864_v26, 7 }
 0x1a9   :  { %v982_v31 = vmax.f32 %v855_v11, %v931_v25  ;;  %v881_v32 = vcombine.high %v879_v18, %v879_v18  ;;  %v941_v33 = vrot.slane %v939_v23, 2  ;;  %v942_v34 = vrot.slane %v880_v50, 7 }
 0x1aa   :  { %v934_v22 = vsel %vm1525_vm6, %v932_v53, %v933_v19  ;;  %v937_v27 = vsel %vm1525_vm6, %v935_v28, %v936_v29  ;;  %v938_v36 = vrot.slane %v936_v29, 2  ;;  %v945_v37 = vrot.slane %v879_v18, 7 }
 0x1ab   :  { %v983_v38 = vmax.f32 %v863_v45, %v934_v22  ;;  %v984_v35 = vmax.f32 %v862_v14, %v937_v27  ;;  %v943_v44 = vsel %vm1525_vm6, %v941_v33, %v942_v34  ;;  %v944_v41 = vrot.slane %v942_v34, 2 }
 0x1ac   :  { %v940_v42 = vsel %vm1525_vm6, %v938_v36, %v939_v23  ;;  %v947_v43 = vrot.slane %v945_v37, 2  ;;  %v1131_v46 = vrot.slane %v881_v32, 9  ;;  %v986_v47 = vmax.f32 %v872_v17, %v943_v44 }
 0x1ad   :  { %v1010_v48 = vcombine.low %v982_v31, %v983_v38  ;;  %v946_v49 = vsel %vm1525_vm6, %v944_v41, %v945_v37  ;;  %v985_v51 = vmax.f32 %v864_v26, %v940_v42  ;;  %v896_v52 = vrot.slane %v882_v24, %v1521_v5 }
 0x1ae   :  { %v987_v55 = vmax.f32 %v880_v50, %v946_v49  ;;  %v988_v56 = vmax.f32 %v879_v18, %v947_v43  ;;  %v897_v39 = vcombine.high %v889_v21, %v889_v21  ;;  %v950_v57 = vrot.slane %v889_v21, 7 }
 0x1af   :  { %v1011_v8 = vcombine.low %v984_v35, %v985_v51  ;;  %v898_v58 = vcombine.high %v896_v52, %v896_v52  ;;  %v956_v59 = vrot.slane %v896_v52, 7  ;;  %v1018_v61 = vrot.slane %v1010_v48, %v1521_v5 }
 0x1b0   :  { %v1027_v62 = vcombine.low %v986_v47, %v987_v55  ;;  %v951_v63 = vsel %vm1525_vm6, %v1131_v46, %v950_v57  ;;  %v952_v0 = vrot.slane %v950_v57, 2  ;;  %v953_v2 = vrot.slane %v897_v39, 7 }
 0x1b1   :  { %v1025_v1 = vrot.slane %v1011_v8, %v1521_v5  ;;  %v958_v3 = vrot.slane %v956_v59, 2  ;;  %v959_v6 = vrot.slane %v898_v58, 7  ;;  %v1041_v9 = vrot.slane %v988_v56, %v1521_v5 }
 0x1b2   :  { %v1034_v7 = vrot.slane %v1027_v62, %v1521_v5  ;;  %v989_v10 = vmax.f32 %v881_v32, %v951_v63  ;;  %v843_v11 = vmax.f32 %v823_v40, %v835_v60  ;;  %v954_v13 = vsel %vm1525_vm6, %v952_v0, %v953_v2 }
 0x1b3   :  { %v1026_v12 = vcombine.low %v1018_v61, %v1025_v1  ;;  %v955_v14 = vrot.slane %v953_v2, 2  ;;  %v960_v45 = vsel %vm1525_vm6, %v958_v3, %v959_v6  ;;  %v990_v4 = vmax.f32 %v889_v21, %v954_v13 }
 0x1b4   :  { %v1042_v15 = vcombine.low %v1034_v7, %v1041_v9  ;;  %v992_v17 = vmax.f32 %v896_v52, %v960_v45  ;;  %v961_v30 = vrot.slane %v959_v6, 2  ;;  %v905_v40 = vrot.slane %v843_v11, %v1521_v5 }
 0x1b5   :  { %1080 = vst [vmem:[%s1583_s3] sm:$0xff] %v1026_v12  ;;  %v957_v20 = vsel %vm1525_vm6, %v955_v14, %v956_v59  ;;  %v1043_v54 = vcombine.low %v989_v10, %v990_v4 }
 0x1b6   :  { %1081 = vst [vmem:[%s1583_s3 + $0x8] sm:$0x1f] %v1042_v15  ;;  %v991_v26 = vmax.f32 %v897_v39, %v957_v20  ;;  %v906_v19 = vcombine.high %v905_v40, %v905_v40  ;;  %v962_v18 = vrot.slane %v905_v40, 7 }
 0x1b7   :  { %v1051_v25 = vrot.slane %v1043_v54, %v1521_v5 }
 0x1b8   :  { %v1044_v50 = vcombine.low %v991_v26, %v992_v17  ;;  %v963_v23 = vsel %vm1525_vm6, %v961_v30, %v962_v18  ;;  %v964_v24 = vrot.slane %v962_v18, 2  ;;  %v965_v21 = vrot.slane %v906_v19, 7 }
 0x1b9   :  { %v993_v28 = vmax.f32 %v898_v58, %v963_v23 }
 0x1ba   :  { %v1058_v53 = vrot.slane %v1044_v50, %v1521_v5  ;;  %v966_v29 = vsel %vm1525_vm6, %v964_v24, %v965_v21  ;;  %v967_v31 = vrot.slane %v965_v21, 2 }
 0x1bb   :  { %v994_v33 = vmax.f32 %v905_v40, %v966_v29 }
 0x1bc   :  { %v1059_v32 = vcombine.low %v1051_v25, %v1058_v53  ;;  %v995_v34 = vmax.f32 %v906_v19, %v967_v31 }
 0x1bd   :  { %v1060_v22 = vcombine.low %v993_v28, %v994_v33 }
 0x1be   :  { %1082 = vst [vmem:[%s1583_s3 + $0x10] sm:$0xff] %v1059_v32  ;;  %v1074_v36 = vrot.slane %v995_v34, %v1521_v5 }
 0x1bf   :  { %v1067_v27 = vrot.slane %v1060_v22, %v1521_v5 }
 0x1c1   :  { %v1075_v37 = vcombine.low %v1067_v27, %v1074_v36 }
 0x1c3   :  { %1083 = vst [vmem:[%s1583_s3 + $0x18] sm:$0x1f] %v1075_v37 }
 0x1c4   :  { %1088 = vsyncpa [#allocation3], 1 }
 0x1c5   :  { %1089 = vsyncpa [#allocation5], 1 }

</bundles_post_ra>
